<compile_context>
chip_gen: v6e
topology: v6e:2x2x1
jax: 0.10.0
libtpu: 0.0.40
codegen_flags: <defaults>
</compile_context>

<pallas_src>
import math

import jax
import jax.numpy as jnp
from jax.experimental import pallas as pl
from jax.experimental.pallas import tpu as pltpu

_LANE = 128
_SUBLANE = 8
# Per-VMEM-buffer byte target.  in + out, double-buffered => 4 buffers, so the
# worst-case resident footprint is ~4 * target = ~16 MiB.
_TARGET_BLOCK_BYTES = 4 * 1024 * 1024
_VMEM_LIMIT = 32 * 1024 * 1024


def _swish_kernel(x_ref, o_ref):
    # x_ref / o_ref: (tM, W) lane-dense VMEM tiles of the flattened input.
    xf = x_ref[...].astype(jnp.float32)       # elementwise math in f32
    y = xf * jax.nn.sigmoid(xf)               # sigmoid -> EUP, mul -> VPU
    o_ref[...] = y.astype(o_ref.dtype)        # single cast at the store


def _cdiv(a, b):
    return -(-a // b)


def _round_up(a, b):
    return _cdiv(a, b) * b


def _pick_width(padded_total):
    # Largest lane-dense slab width that exactly divides the (padded) size.
    for w in (1024, 512, 256, 128):
        if padded_total % w == 0:
            return w
    return _LANE  # unreachable: padded_total is always a multiple of 128


@jax.jit
def swish(x):
    """Swish / SiLU: x * sigmoid(x), elementwise, arbitrary input shape."""
    orig_shape = x.shape
    total = math.prod(orig_shape) if orig_shape else 1
    if total == 0:
        return x

    itemsize = jnp.dtype(x.dtype).itemsize
    flat = x.reshape(-1)                      # free row-major flatten

    # Lane-dense 2-D slab (R, W), W % 128 == 0.  Elementwise op => layout is
    # free to choose; pad only when the element count is not a lane multiple.
    padded_total = _round_up(total, _LANE)
    if padded_total != total:
        flat = jnp.pad(flat, (0, padded_total - total))
    W = _pick_width(padded_total)
    R = padded_total // W
    x2 = flat.reshape(R, W)

    # Dtype-aware row tile: ~_TARGET_BLOCK_BYTES per block, sublane-aligned,
    # with a cdiv grid (Pallas masks the ragged trailing block).
    tm_max = max(_SUBLANE,
                 (_TARGET_BLOCK_BYTES // (W * itemsize)) // _SUBLANE * _SUBLANE)
    if R <= tm_max:
        # Whole thing fits one block: split into 2 grid points when there is
        # enough data, so v7x's two TensorCores both get work.
        tm = R if R <= _SUBLANE else _round_up(_cdiv(R, 2), _SUBLANE)
    else:
        tm = tm_max
    grid = (_cdiv(R, tm),)

    cost = pl.CostEstimate(
        flops=4 * padded_total,
        transcendentals=padded_total,
        bytes_accessed=2 * padded_total * itemsize,
    )

    out2 = pl.pallas_call(
        _swish_kernel,
        out_shape=jax.ShapeDtypeStruct((R, W), x.dtype),
        grid=grid,
        in_specs=[pl.BlockSpec((tm, W), lambda i: (i, 0))],
        out_specs=pl.BlockSpec((tm, W), lambda i: (i, 0)),
        compiler_params=pltpu.CompilerParams(
            dimension_semantics=("parallel",),
            vmem_limit_bytes=_VMEM_LIMIT,
        ),
        cost_estimate=cost,
    )(x2)

    out_flat = out2.reshape(-1)
    if padded_total != total:
        out_flat = out_flat[:total]
    return out_flat.reshape(orig_shape)


def _reference(x):
    xf = x.astype(jnp.float32)
    return (xf * jax.nn.sigmoid(xf)).astype(x.dtype)


if __name__ == "__main__":
    # Small deterministic example consistent with the module (elementwise
    # activation on an activation tensor): batch=2, seq=8, hidden=32.
    x = jax.random.normal(jax.random.PRNGKey(0), (2, 8, 32), dtype=jnp.float32)
    out = jax.block_until_ready(swish(x))
    ref = _reference(x)
    assert out.shape == x.shape
    assert jnp.allclose(out, ref, atol=1e-6, rtol=1e-6), \
        float(jnp.max(jnp.abs(out - ref)))

    # Ragged last dim / non-multiple-of-128 element count -> pad path, still
    # lane-dense inside the kernel.
    x_odd = jax.random.normal(jax.random.PRNGKey(1), (3, 7, 11),
                              dtype=jnp.float32)
    out_odd = jax.block_until_ready(swish(x_odd))
    ref_odd = _reference(x_odd)
    assert out_odd.shape == x_odd.shape
    assert jnp.allclose(out_odd, ref_odd, atol=1e-6, rtol=1e-6)

    # bf16 multi-block path (grid of 2 row tiles, dtype-aware tile sizing).
    x_big = jax.random.normal(jax.random.PRNGKey(2), (4, 256, 512),
                              dtype=jnp.bfloat16)
    out_big = jax.block_until_ready(swish(x_big))
    ref_big = _reference(x_big)
    assert out_big.shape == x_big.shape
    assert jnp.allclose(out_big.astype(jnp.float32),
                        ref_big.astype(jnp.float32), atol=2e-2, rtol=2e-2)

    print("KERNEL_OK")
</pallas_src>

<mosaic_0001>
module attributes {stable_mosaic.version = 11 : i64} {
  func.func @_swish_kernel(%arg0: i32, %arg1: memref<1x512xf32, #tpu.memory_space<vmem>>, %arg2: memref<1x512xf32, #tpu.memory_space<vmem>>) attributes {dimension_semantics = [#tpu.dimension_semantics<parallel>], iteration_bounds = array<i64: 1>, scalar_prefetch = 0 : i64, scratch_operands = 0 : i64, tpu.core_type = #tpu.core_type<tc>, window_params = [{transform_indices = @transform_0, window_bounds = array<i64: 1, 512>}, {transform_indices = @transform_1, window_bounds = array<i64: 1, 512>}]} {
    %c0 = arith.constant 0 : index
    %c0_0 = arith.constant 0 : index
    %0 = vector.load %arg1[%c0, %c0_0] : memref<1x512xf32, #tpu.memory_space<vmem>>, vector<1x512xf32>
    %1 = arith.negf %0 : vector<1x512xf32>
    %2 = math.exp %1 : vector<1x512xf32>
    %cst = arith.constant 1.000000e+00 : f32
    %3 = vector.broadcast %cst : f32 to vector<1x512xf32>
    %4 = arith.addf %3, %2 : vector<1x512xf32>
    %5 = arith.divf %3, %4 : vector<1x512xf32>
    %6 = arith.mulf %0, %5 : vector<1x512xf32>
    %c0_1 = arith.constant 0 : index
    %c0_2 = arith.constant 0 : index
    %7 = vector.load %arg2[%c0_1, %c0_2] : memref<1x512xf32, #tpu.memory_space<vmem>>, vector<1x512xf32>
    tpu.vector_store %arg2[%c0_1, %c0_2], %6 {strides = array<i32>} : memref<1x512xf32, #tpu.memory_space<vmem>>, vector<1x512xf32>,
    return
  }
  func.func @transform_0(%arg0: i32) -> (i32, i32) {
    %c0_i32 = arith.constant 0 : i32
    %c0_i32_0 = arith.constant 0 : i32
    return %arg0, %c0_i32 : i32, i32
  }
  func.func @transform_1(%arg0: i32) -> (i32, i32) {
    %c0_i32 = arith.constant 0 : i32
    %c0_i32_0 = arith.constant 0 : i32
    return %arg0, %c0_i32 : i32, i32
  }
}

</mosaic_0001>

<bundles_post_ra>
// kernel: swish.1
= control target key start
LH: loop header
LB: loop body
LE: loop exit
PB: predicated region body
PF: predicated region fallthrough
CT: control target
= control target key end

     0   :  { %v16_v4 = vlaneseq  ;;  %s46_s0 = inlined_call_operand.vmem [shape: f32[1,512], index: 0, kind: input, shape index: {}]   ;;  %s47_s1 = inlined_call_operand.vmem [shape: f32[1,512], index: 1, kind: output, shape index: {}]  }
   0x1   :  { %v8_v0 = vld [vmem:[%s46_s0] sm:$0xf] }
   0x2   :  { %v25_v1 = vmul.f32 -1.442695, %v8_v0  ;;  %vm18_vm0 = vcmp.lt.s32.totalorder %v16_v4, 512 }
   0x4   :  { %26 = vpow2.f32 %v25_v1 }
  0x11   :  { %v27_v2 = vpop.eup %26 }
  0x12   :  { %v12_v3 = vadd.f32 1.0, %v27_v2 }
  0x14   :  { %28 = vrcp.f32 %v12_v3 }
  0x21   :  { %v29_v5 = vpop.eup %28 }
  0x22   :  { %v15_v6 = vmul.f32 %v29_v5, %v8_v0 }
  0x24   :  { %20 = vst.msk [vmem:[%s47_s1] sm:$0xf] %vm18_vm0, %v15_v6 }

</bundles_post_ra>
